<compile_context>
chip_gen: v7x
topology: tpu7x:2x2x1
jax: 0.10.0
libtpu: 0.0.40
codegen_flags: <defaults>
</compile_context>

<pallas_src>
import functools

import jax
import jax.numpy as jnp
from jax.experimental import pallas as pl
from jax.experimental.pallas import tpu as pltpu

LANE = 128
SUBLANE = 8
RT = 128  # in-kernel sub-tile rows (bounds vreg pressure)


def _round_up(x, m):
    return (x + m - 1) // m * m


def _cdiv(a, b):
    return (a + b - 1) // b


def _pick_batch_tile(batch, backcast, u_p, resident_bytes):
    """Largest batch tile that (a) fits a conservative VMEM budget including the
    resident weights, (b) amortizes per-step overhead, and (c) leaves >=2 grid
    blocks when the batch permits (v7x megacore sharding)."""
    per_row = 2 * (backcast * 4 + u_p * 2)        # double-buffered f32 in + bf16 out tiles
    budget = (12 << 20) - resident_bytes          # headroom vs v5e's 16 MiB scoped default
    cap = max(SUBLANE, budget // max(per_row, 1))
    cap = min(cap, 2048)                          # amortize ~0.35 us/step overhead
    b8 = _round_up(batch, SUBLANE)
    if b8 >= 2 * SUBLANE:
        cap = min(cap, _round_up(_cdiv(b8, 2), SUBLANE))   # >=2 blocks for 2 TCs
    tb = min(cap, b8)
    if tb >= RT:
        tb = (tb // RT) * RT                      # exact sub-tiling inside the kernel
    else:
        tb = _round_up(tb, SUBLANE)
    return tb


def _make_fc_kernel(num_layers, tb, rt):
    """Fused FC stack: num_layers x (Linear -> ReLU), sub-tiled over rows."""
    n_sub = tb // rt

    def kernel(x_ref, *refs):
        *w_refs, b_ref, out_ref = refs
        b_all = b_ref[...]                                 # (L, U_P) f32, loaded once
        for s in range(n_sub):                             # static slices -> ref views
            rows = pl.ds(s * rt, rt)
            h = x_ref[rows, :].astype(jnp.bfloat16)        # (rt, backcast) bf16
            for l in range(num_layers):
                y = jnp.dot(h, w_refs[l][...],
                            preferred_element_type=jnp.float32)    # MXU, f32 acc
                h = jnp.maximum(y + b_all[l:l + 1, :], 0.0).astype(jnp.bfloat16)
            out_ref[rows, :] = h                           # bf16 writeback

    return kernel


def nbeats_block_forward(x, packed, *, num_layers, units, min_pallas_rows=0):
    """x: (batch, backcast_length) f32 -> (batch, units) f32."""
    batch, backcast = x.shape
    u_p = packed["b"].shape[1]

    if batch < min_pallas_rows:
        # XLA fallback: at very small batches the pallas_call is pure launch/DMA overhead.
        h = x.astype(jnp.bfloat16)
        for l in range(num_layers):
            y = jnp.dot(h, packed[f"w{l}"], preferred_element_type=jnp.float32)
            h = jnp.maximum(y + packed["b"][l:l + 1, :], 0.0).astype(jnp.bfloat16)
        return h[:, :units].astype(jnp.float32)

    # double-buffered resident operand bytes (weights + stacked biases)
    resident = 0
    for l in range(num_layers):
        w = packed[f"w{l}"]
        resident += 2 * w.size * w.dtype.itemsize
    resident += 2 * packed["b"].size * packed["b"].dtype.itemsize

    tb = _pick_batch_tile(batch, backcast, u_p, resident)
    rt = min(tb, RT)
    grid = (_cdiv(batch, tb),)

    flat = [x]
    in_specs = [pl.BlockSpec((tb, backcast), lambda i: (i, 0))]
    for l in range(num_layers):
        w = packed[f"w{l}"]
        flat.append(w)
        # constant block index -> weights stay pinned in VMEM across grid steps
        in_specs.append(pl.BlockSpec(w.shape, lambda i: (0, 0)))
    flat.append(packed["b"])
    in_specs.append(pl.BlockSpec(packed["b"].shape, lambda i: (0, 0)))

    out = pl.pallas_call(
        _make_fc_kernel(num_layers, tb, rt),
        out_shape=jax.ShapeDtypeStruct((batch, u_p), jnp.bfloat16),
        grid=grid,
        in_specs=in_specs,
        out_specs=pl.BlockSpec((tb, u_p), lambda i: (i, 0)),
        compiler_params=pltpu.CompilerParams(
            dimension_semantics=("parallel",)),
    )(*flat)
    return out[:, :units].astype(jnp.float32)


def init_nbeats_params(key, units, backcast_length, num_block_layers=4):
    """PyTorch-style uniform(-1/sqrt(fan_in), 1/sqrt(fan_in)) init.

    Weights stored transposed relative to nn.Linear, i.e. (in, out); biases (1, out).
    """
    params = {}
    in_sizes = [backcast_length] + [units] * (num_block_layers - 1)
    for i, fan_in in enumerate(in_sizes):
        key, kw, kb = jax.random.split(key, 3)
        bound = 1.0 / jnp.sqrt(jnp.float32(fan_in))
        params[f"w{i}"] = jax.random.uniform(
            kw, (fan_in, units), jnp.float32, minval=-bound, maxval=bound)
        params[f"b{i}"] = jax.random.uniform(
            kb, (1, units), jnp.float32, minval=-bound, maxval=bound)
    return params


def pack_params(params, num_layers, backcast_length, units):
    """Lane-dense packing: output dim padded to a multiple of 128 (zeros),
    first-layer K kept at the real backcast length, biases stacked (L, u_p) f32."""
    u_p = _round_up(units, LANE)
    packed = {}
    for l in range(num_layers):
        fan_in = backcast_length if l == 0 else units
        rows = backcast_length if l == 0 else u_p
        w = jnp.zeros((rows, u_p), jnp.bfloat16).at[:fan_in, :units].set(
            params[f"w{l}"].astype(jnp.bfloat16))
        packed[f"w{l}"] = w
    b = jnp.zeros((num_layers, u_p), jnp.float32)
    for l in range(num_layers):
        b = b.at[l, :units].set(params[f"b{l}"][0])
    packed["b"] = b
    return packed


def reference_forward(x, params, num_layers):
    """Plain-JAX reference with the same bf16-operand / f32-accumulate / bf16-carry
    recipe as the kernel.  NOTE: this validates Pallas-vs-bf16-JAX; parity with f32
    PyTorch nn.Linear is only approximate (bf16 quantization, grows with fan_in)."""
    h = x.astype(jnp.bfloat16)
    for i in range(num_layers):
        y = jnp.dot(h, params[f"w{i}"].astype(jnp.bfloat16),
                    preferred_element_type=jnp.float32)
        h = jnp.maximum(y + params[f"b{i}"], 0.0).astype(jnp.bfloat16)
    return h.astype(jnp.float32)


if __name__ == "__main__":
    # NBEATSBlock(units=32, thetas_dim=8, num_block_layers=4,
    #             backcast_length=10, forecast_length=5); forward() == self.fc(x)
    units = 32
    backcast_length = 10
    num_block_layers = 4
    batch = 8

    key = jax.random.PRNGKey(0)
    key, kx = jax.random.split(key)
    x = jax.random.normal(kx, (batch, backcast_length), jnp.float32)
    params = init_nbeats_params(key, units, backcast_length, num_block_layers)
    packed = pack_params(params, num_block_layers, backcast_length, units)

    fwd = jax.jit(functools.partial(
        nbeats_block_forward, num_layers=num_block_layers, units=units))
    out = jax.block_until_ready(fwd(x, packed))

    ref = reference_forward(x, params, num_block_layers)
    assert out.shape == (batch, units), out.shape
    err = float(jnp.max(jnp.abs(out - ref)))
    assert err < 1e-2, f"mismatch vs JAX reference, max abs err = {err}"

    print("KERNEL_OK")
</pallas_src>

<mosaic_0001>
module attributes {stable_mosaic.version = 11 : i64} {
  func.func @kernel(%arg0: i32, %arg1: memref<8x10xf32, #tpu.memory_space<vmem>>, %arg2: memref<10x128xbf16, #tpu.memory_space<vmem>>, %arg3: memref<128x128xbf16, #tpu.memory_space<vmem>>, %arg4: memref<128x128xbf16, #tpu.memory_space<vmem>>, %arg5: memref<128x128xbf16, #tpu.memory_space<vmem>>, %arg6: memref<4x128xf32, #tpu.memory_space<vmem>>, %arg7: memref<8x128xbf16, #tpu.memory_space<vmem>>) attributes {dimension_semantics = [#tpu.dimension_semantics<parallel>], iteration_bounds = array<i64: 1>, scalar_prefetch = 0 : i64, scratch_operands = 0 : i64, tpu.core_type = #tpu.core_type<tc>, window_params = [{transform_indices = @transform_0, window_bounds = array<i64: 8, 10>}, {pipeline_mode = #tpu.pipeline_mode<synchronous>, transform_indices = @transform_1, window_bounds = array<i64: 10, 128>}, {pipeline_mode = #tpu.pipeline_mode<synchronous>, transform_indices = @transform_2, window_bounds = array<i64: 128, 128>}, {pipeline_mode = #tpu.pipeline_mode<synchronous>, transform_indices = @transform_3, window_bounds = array<i64: 128, 128>}, {pipeline_mode = #tpu.pipeline_mode<synchronous>, transform_indices = @transform_4, window_bounds = array<i64: 128, 128>}, {pipeline_mode = #tpu.pipeline_mode<synchronous>, transform_indices = @transform_5, window_bounds = array<i64: 4, 128>}, {transform_indices = @transform_6, window_bounds = array<i64: 8, 128>}]} {
    %c0 = arith.constant 0 : index
    %c0_0 = arith.constant 0 : index
    %0 = vector.load %arg6[%c0, %c0_0] : memref<4x128xf32, #tpu.memory_space<vmem>>, vector<4x128xf32>
    %c0_1 = arith.constant 0 : index
    %c0_2 = arith.constant 0 : index
    %1 = vector.load %arg1[%c0_1, %c0_2] : memref<8x10xf32, #tpu.memory_space<vmem>>, vector<8x10xf32>
    %2 = arith.truncf %1 : vector<8x10xf32> to vector<8x10xbf16>
    %c0_3 = arith.constant 0 : index
    %c0_4 = arith.constant 0 : index
    %3 = vector.load %arg2[%c0_3, %c0_4] : memref<10x128xbf16, #tpu.memory_space<vmem>>, vector<10x128xbf16>
    %cst = arith.constant dense<0.000000e+00> : vector<8x128xf32>
    %4 = tpu.matmul %2, %3, %cst {dimension_numbers = #tpu.dot_dimension_numbers<[1], [0], [0], [1], [0, 0, 1, 1], [], []>} : vector<8x10xbf16>, vector<10x128xbf16>, vector<8x128xf32> -> vector<8x128xf32>
    %5 = vector.extract_strided_slice %0 {offsets = [0, 0], sizes = [1, 128], strides = [1, 1]} : vector<4x128xf32> to vector<1x128xf32>
    %6 = vector.broadcast %5 : vector<1x128xf32> to vector<8x128xf32>
    %7 = arith.addf %4, %6 : vector<8x128xf32>
    %cst_5 = arith.constant 0.000000e+00 : f32
    %8 = vector.broadcast %cst_5 : f32 to vector<8x128xf32>
    %9 = arith.maximumf %7, %8 : vector<8x128xf32>
    %10 = arith.truncf %9 : vector<8x128xf32> to vector<8x128xbf16>
    %c0_6 = arith.constant 0 : index
    %c0_7 = arith.constant 0 : index
    %11 = vector.load %arg3[%c0_6, %c0_7] : memref<128x128xbf16, #tpu.memory_space<vmem>>, vector<128x128xbf16>
    %cst_8 = arith.constant dense<0.000000e+00> : vector<8x128xf32>
    %12 = tpu.matmul %10, %11, %cst_8 {dimension_numbers = #tpu.dot_dimension_numbers<[1], [0], [0], [1], [0, 0, 1, 1], [], []>} : vector<8x128xbf16>, vector<128x128xbf16>, vector<8x128xf32> -> vector<8x128xf32>
    %13 = vector.extract_strided_slice %0 {offsets = [1, 0], sizes = [1, 128], strides = [1, 1]} : vector<4x128xf32> to vector<1x128xf32>
    %14 = vector.broadcast %13 : vector<1x128xf32> to vector<8x128xf32>
    %15 = arith.addf %12, %14 : vector<8x128xf32>
    %cst_9 = arith.constant 0.000000e+00 : f32
    %16 = vector.broadcast %cst_9 : f32 to vector<8x128xf32>
    %17 = arith.maximumf %15, %16 : vector<8x128xf32>
    %18 = arith.truncf %17 : vector<8x128xf32> to vector<8x128xbf16>
    %c0_10 = arith.constant 0 : index
    %c0_11 = arith.constant 0 : index
    %19 = vector.load %arg4[%c0_10, %c0_11] : memref<128x128xbf16, #tpu.memory_space<vmem>>, vector<128x128xbf16>
    %cst_12 = arith.constant dense<0.000000e+00> : vector<8x128xf32>
    %20 = tpu.matmul %18, %19, %cst_12 {dimension_numbers = #tpu.dot_dimension_numbers<[1], [0], [0], [1], [0, 0, 1, 1], [], []>} : vector<8x128xbf16>, vector<128x128xbf16>, vector<8x128xf32> -> vector<8x128xf32>
    %21 = vector.extract_strided_slice %0 {offsets = [2, 0], sizes = [1, 128], strides = [1, 1]} : vector<4x128xf32> to vector<1x128xf32>
    %22 = vector.broadcast %21 : vector<1x128xf32> to vector<8x128xf32>
    %23 = arith.addf %20, %22 : vector<8x128xf32>
    %cst_13 = arith.constant 0.000000e+00 : f32
    %24 = vector.broadcast %cst_13 : f32 to vector<8x128xf32>
    %25 = arith.maximumf %23, %24 : vector<8x128xf32>
    %26 = arith.truncf %25 : vector<8x128xf32> to vector<8x128xbf16>
    %c0_14 = arith.constant 0 : index
    %c0_15 = arith.constant 0 : index
    %27 = vector.load %arg5[%c0_14, %c0_15] : memref<128x128xbf16, #tpu.memory_space<vmem>>, vector<128x128xbf16>
    %cst_16 = arith.constant dense<0.000000e+00> : vector<8x128xf32>
    %28 = tpu.matmul %26, %27, %cst_16 {dimension_numbers = #tpu.dot_dimension_numbers<[1], [0], [0], [1], [0, 0, 1, 1], [], []>} : vector<8x128xbf16>, vector<128x128xbf16>, vector<8x128xf32> -> vector<8x128xf32>
    %29 = vector.extract_strided_slice %0 {offsets = [3, 0], sizes = [1, 128], strides = [1, 1]} : vector<4x128xf32> to vector<1x128xf32>
    %30 = vector.broadcast %29 : vector<1x128xf32> to vector<8x128xf32>
    %31 = arith.addf %28, %30 : vector<8x128xf32>
    %cst_17 = arith.constant 0.000000e+00 : f32
    %32 = vector.broadcast %cst_17 : f32 to vector<8x128xf32>
    %33 = arith.maximumf %31, %32 : vector<8x128xf32>
    %34 = arith.truncf %33 : vector<8x128xf32> to vector<8x128xbf16>
    %c0_18 = arith.constant 0 : index
    %c0_19 = arith.constant 0 : index
    %35 = vector.load %arg7[%c0_18, %c0_19] : memref<8x128xbf16, #tpu.memory_space<vmem>>, vector<8x128xbf16>
    tpu.vector_store %arg7[%c0_18, %c0_19], %34 {strides = array<i32>} : memref<8x128xbf16, #tpu.memory_space<vmem>>, vector<8x128xbf16>,
    return
  }
  func.func @transform_0(%arg0: i32) -> (i32, i32) {
    %c0_i32 = arith.constant 0 : i32
    %c0_i32_0 = arith.constant 0 : i32
    return %arg0, %c0_i32 : i32, i32
  }
  func.func @transform_1(%arg0: i32) -> (i32, i32) {
    %c0_i32 = arith.constant 0 : i32
    %c0_i32_0 = arith.constant 0 : i32
    %c0_i32_1 = arith.constant 0 : i32
    return %c0_i32, %c0_i32_0 : i32, i32
  }
  func.func @transform_2(%arg0: i32) -> (i32, i32) {
    %c0_i32 = arith.constant 0 : i32
    %c0_i32_0 = arith.constant 0 : i32
    %c0_i32_1 = arith.constant 0 : i32
    return %c0_i32, %c0_i32_0 : i32, i32
  }
  func.func @transform_3(%arg0: i32) -> (i32, i32) {
    %c0_i32 = arith.constant 0 : i32
    %c0_i32_0 = arith.constant 0 : i32
    %c0_i32_1 = arith.constant 0 : i32
    return %c0_i32, %c0_i32_0 : i32, i32
  }
  func.func @transform_4(%arg0: i32) -> (i32, i32) {
    %c0_i32 = arith.constant 0 : i32
    %c0_i32_0 = arith.constant 0 : i32
    %c0_i32_1 = arith.constant 0 : i32
    return %c0_i32, %c0_i32_0 : i32, i32
  }
  func.func @transform_5(%arg0: i32) -> (i32, i32) {
    %c0_i32 = arith.constant 0 : i32
    %c0_i32_0 = arith.constant 0 : i32
    %c0_i32_1 = arith.constant 0 : i32
    return %c0_i32, %c0_i32_0 : i32, i32
  }
  func.func @transform_6(%arg0: i32) -> (i32, i32) {
    %c0_i32 = arith.constant 0 : i32
    %c0_i32_0 = arith.constant 0 : i32
    return %arg0, %c0_i32 : i32, i32
  }
}

</mosaic_0001>

<bundles_post_ra>
// kernel: nbeats_block_forward.1
= control target key start
LH: loop header
LB: loop body
LE: loop exit
PB: predicated region body
PF: predicated region fallthrough
CT: control target
= control target key end

     0   :  { %11 = vsyncpa [#allocation3], 0  ;;  %s972_s0 = inlined_call_operand.hbm [shape: f32[8,10], index: 0, kind: input, shape index: {}]   ;;  %s973_s1 = inlined_call_operand.hbm [shape: bf16[10,128], index: 1, kind: input, shape index: {}]   ;;  %s974_s2 = inlined_call_operand.hbm [shape: bf16[128,128], index: 2, kind: input, shape index: {}]   ;;  %s975_s3 = inlined_call_operand.hbm [shape: bf16[128,128], index: 3, kind: input, shape index: {}]   ;;  %s976_s4 = inlined_call_operand.hbm [shape: bf16[128,128], index: 4, kind: input, shape index: {}]   ;;  %s977_s5 = inlined_call_operand.hbm [shape: f32[4,128], index: 5, kind: input, shape index: {}]   ;;  %s978_s6 = inlined_call_operand.vmem [shape: bf16[8,128], index: 6, kind: output, shape index: {}]  }
   0x1   :  { %12 = vsyncpa [#allocation5], 0 }
   0x2   :  { %13 = vsyncpa [#allocation8], 0 }
   0x3   :  { %14 = vsyncpa [#allocation11], 0  ;;  %s801_s21 = smov [#allocation4]   ;;  %s661_s25 = scalar_lea.hbm %s973_s1, 128 }
   0x4   :  { %s30_s22 = sshll.u32 %s801_s21, 4  ;;  %p662_p0 = scmp.ne.s32.totalorder %s973_s1, %s661_s25  ;;  %s31_s22 = int_to_ptr.vmem [resolvable:$true] %s30_s22 }
   0x5   :  { %p665_p1 = scmp.lt.u32.totalorder %s661_s25, %s973_s1 }
   0x7   :  { %p667_p2 = pnand %p665_p1, %p662_p0 }
   0x9   :  { %670 = shalt.err (!%p667_p2)
}
   0xa   :  { %s671_s30 = scalar_lea.vmem %s31_s22, 128  ;;  %p676_p4 = scmp.lt.s32.totalorder %s31_s22, %s31_s22 }
   0xb   :  { %p672_p3 = scmp.ne.s32.totalorder %s31_s22, %s671_s30  ;;  %p677_p5 = scmp.lt.s32.totalorder %s671_s30, %s671_s30 }
   0xd   :  { %p678_p6 = por %p677_p5, %p676_p4 }
   0xf   :  { %p679_p7 = pnand %p678_p6, %p672_p3 }
  0x11   :  { %682 = shalt.err (!%p679_p7)
}
  0x12   :  { %s802_s7 = smov 64   ;;  %s803_s8 = smov 4  }
  0x13   :  { %36 = dma.hbm_to_vmem [thread:$0]  %s973_s1, 128, %s31_s22, [#allocation5], %s802_s7, %s802_s7, %s803_s8  }
  0x14   :  { %s804_s11 = smov [#allocation7]   ;;  %s805_s13 = smov [#allocation2]  }
  0x15   :  { %s54_s12 = sshll.u32 %s804_s11, 4  ;;  %s21_s14 = sshll.u32 %s805_s13, 4  ;;  %s55_s12 = int_to_ptr.vmem [resolvable:$true] %s54_s12  ;;  %s22_s14 = int_to_ptr.vmem [resolvable:$true] %s21_s14 }
  0x16   :  { %s683_s17 = scalar_lea.hbm %s975_s3, 1024 }
  0x17   :  { %p684_p8 = scmp.ne.s32.totalorder %s975_s3, %s683_s17  ;;  %p687_p9 = scmp.lt.u32.totalorder %s683_s17, %s975_s3 }
  0x19   :  { %p689_p10 = pnand %p687_p9, %p684_p8 }
  0x1b   :  { %692 = shalt.err (!%p689_p10)
}
  0x1c   :  { %s693_s1 = scalar_lea.vmem %s55_s12, 1024  ;;  %p698_p12 = scmp.lt.s32.totalorder %s55_s12, %s55_s12 }
  0x1d   :  { %p694_p11 = scmp.ne.s32.totalorder %s55_s12, %s693_s1  ;;  %p699_p13 = scmp.lt.s32.totalorder %s693_s1, %s693_s1 }
  0x1f   :  { %p700_p0 = por %p699_p13, %p698_p12 }
  0x21   :  { %p701_p1 = pnand %p700_p0, %p694_p11 }
  0x23   :  { %704 = shalt.err (!%p701_p1)
}
  0x24   :  { %60 = dma.hbm_to_vmem [thread:$0]  %s975_s3, 1024, %s55_s12, [#allocation8], %s802_s7, %s802_s7, %s803_s8  }
  0x25   :  { %s705_s26 = scalar_lea.hbm %s972_s0, 128 }
  0x26   :  { %p706_p2 = scmp.ne.s32.totalorder %s972_s0, %s705_s26  ;;  %p709_p3 = scmp.lt.u32.totalorder %s705_s26, %s972_s0 }
  0x28   :  { %p711_p4 = pnand %p709_p3, %p706_p2 }
  0x2a   :  { %714 = shalt.err (!%p711_p4)
}
  0x2b   :  { %s715_s9 = scalar_lea.vmem %s22_s14, 128  ;;  %p720_p6 = scmp.lt.s32.totalorder %s22_s14, %s22_s14 }
  0x2c   :  { %p716_p5 = scmp.ne.s32.totalorder %s22_s14, %s715_s9  ;;  %p721_p7 = scmp.lt.s32.totalorder %s715_s9, %s715_s9 }
  0x2e   :  { %p722_p8 = por %p721_p7, %p720_p6 }
  0x30   :  { %p723_p9 = pnand %p722_p8, %p716_p5 }
  0x32   :  { %726 = shalt.err (!%p723_p9)
}
  0x33   :  { %24 = dma.hbm_to_vmem [thread:$0]  %s972_s0, 128, %s22_s14, [#allocation3]  }
  0x34   :  { %s806_s11 = smov [#allocation6]   ;;  %s807_s13 = smov [#allocation9]  }
  0x35   :  { %s42_s12 = sshll.u32 %s806_s11, 4  ;;  %s66_s15 = sshll.u32 %s807_s13, 4  ;;  %s43_s12 = int_to_ptr.vmem [resolvable:$true] %s42_s12  ;;  %s67_s15 = int_to_ptr.vmem [resolvable:$true] %s66_s15 }
  0x36   :  { %s727_s18 = scalar_lea.hbm %s974_s2, 1024 }
  0x37   :  { %p728_p10 = scmp.ne.s32.totalorder %s974_s2, %s727_s18  ;;  %p731_p11 = scmp.lt.u32.totalorder %s727_s18, %s974_s2 }
  0x39   :  { %p733_p12 = pnand %p731_p11, %p728_p10 }
  0x3b   :  { %736 = shalt.err (!%p733_p12)
}
  0x3c   :  { %s737_s0 = scalar_lea.vmem %s43_s12, 1024  ;;  %p742_p0 = scmp.lt.s32.totalorder %s43_s12, %s43_s12 }
  0x3d   :  { %p738_p13 = scmp.ne.s32.totalorder %s43_s12, %s737_s0  ;;  %p743_p1 = scmp.lt.s32.totalorder %s737_s0, %s737_s0 }
  0x3f   :  { %p744_p2 = por %p743_p1, %p742_p0 }
  0x41   :  { %p745_p3 = pnand %p744_p2, %p738_p13 }
  0x43   :  { %748 = shalt.err (!%p745_p3)
}
  0x44   :  { %48 = dma.hbm_to_vmem [thread:$0]  %s974_s2, 1024, %s43_s12, [#allocation5], %s802_s7, %s802_s7, %s803_s8  }
  0x45   :  { %s749_s25 = scalar_lea.hbm %s976_s4, 1024 }
  0x46   :  { %p750_p4 = scmp.ne.s32.totalorder %s976_s4, %s749_s25  ;;  %p753_p5 = scmp.lt.u32.totalorder %s749_s25, %s976_s4 }
  0x48   :  { %p755_p6 = pnand %p753_p5, %p750_p4 }
  0x4a   :  { %758 = shalt.err (!%p755_p6)
}
  0x4b   :  { %s759_s30 = scalar_lea.vmem %s67_s15, 1024  ;;  %p764_p8 = scmp.lt.s32.totalorder %s67_s15, %s67_s15 }
  0x4c   :  { %p760_p7 = scmp.ne.s32.totalorder %s67_s15, %s759_s30  ;;  %p765_p9 = scmp.lt.s32.totalorder %s759_s30, %s759_s30 }
  0x4e   :  { %p766_p10 = por %p765_p9, %p764_p8 }
  0x50   :  { %p767_p11 = pnand %p766_p10, %p760_p7 }
  0x52   :  { %770 = shalt.err (!%p767_p11)
}
  0x53   :  { %72 = dma.hbm_to_vmem [thread:$0]  %s976_s4, 1024, %s67_s15, [#allocation8], %s802_s7, %s802_s7, %s803_s8  }
  0x54   :  { %s808_s3 = smov [#allocation10]   ;;  %s771_s13 = scalar_lea.hbm %s977_s5, 64 }
  0x55   :  { %s79_s10 = sshll.u32 %s808_s3, 4  ;;  %p772_p12 = scmp.ne.s32.totalorder %s977_s5, %s771_s13  ;;  %s80_s10 = int_to_ptr.vmem [resolvable:$true] %s79_s10 }
  0x56   :  { %p775_p13 = scmp.lt.u32.totalorder %s771_s13, %s977_s5 }
  0x58   :  { %p777_p0 = pnand %p775_p13, %p772_p12 }
  0x5a   :  { %780 = shalt.err (!%p777_p0)
}
  0x5b   :  { %s781_s20 = scalar_lea.vmem %s80_s10, 64  ;;  %p786_p2 = scmp.lt.s32.totalorder %s80_s10, %s80_s10 }
  0x5c   :  { %p782_p1 = scmp.ne.s32.totalorder %s80_s10, %s781_s20  ;;  %p787_p3 = scmp.lt.s32.totalorder %s781_s20, %s781_s20 }
  0x5e   :  { %p788_p4 = por %p787_p3, %p786_p2 }
  0x60   :  { %p789_p5 = pnand %p788_p4, %p782_p1 }
  0x62   :  { %792 = shalt.err (!%p789_p5)
}
  0x63   :  { %82 = dma.hbm_to_vmem [thread:$0]  %s977_s5, 64, %s80_s10, [#allocation11]  }
  0x64   :  { %793 = dma.done.wait [#allocation3], 128  }
  0x65   :  { %794 = vsyncadd [#allocation3], 4294967168 }
  0x66   :  { %795 = dma.done.wait [#allocation5], 1152  }
  0x67   :  { %796 = vsyncadd [#allocation5], 4294966144 }
  0x68   :  { %797 = dma.done.wait [#allocation8], 2048  }
  0x69   :  { %798 = vsyncadd [#allocation8], 4294965248 }
  0x6a   :  { %799 = dma.done.wait [#allocation11], 64  }
  0x6b   :  { %800 = vsyncadd [#allocation11], 4294967232  ;;  %v809_v0 = vmov 0.0   ;;  %vm810_vm0 = vmmov 0   ;;  %vm120_vm1 = vcmask 1044480   ;;  %v103_v2 = vld [vmem:[#allocation2] sm:$0xff]  ;;  %v107_v19 = vlaneseq }
  0x6c   :  { %560 = vmatprep.subr.bf16.mxu0 %v809_v0  ;;  %562 = vmatprep.mubr.msk.bf16.mxu0 %vm810_vm0, %v809_v0  ;;  %v636_v1 = vld [vmem:[#allocation4] sm:$0x1f]   ;;  %v104_v4 = vpack.c.bf16 %v103_v2, %v103_v2  ;;  %v637_v5 = vld [vmem:[#allocation6] sm:$0xff]   ;;  %vm116_vm2 = vcmask 80896   ;;  %v638_v6 = vld [vmem:[#allocation6 + $0x8] sm:$0xff]  }
  0x6d   :  { %566 = vmatprep.subr.bf16.mxu1 %v809_v0  ;;  %582 = vmatprep.mubr.msk.bf16.mxu1 %vm810_vm0, %v809_v0  ;;  %v122_v3 = vsel %vm120_vm1, %v636_v1, 0  ;;  %v639_v7 = vld [vmem:[#allocation6 + $0x10] sm:$0xff]   ;;  %v640_v8 = vld [vmem:[#allocation6 + $0x18] sm:$0xff]   ;;  %v641_v9 = vld [vmem:[#allocation6 + $0x20] sm:$0xff]   ;;  %v953_v20 = vshrl.u32 %v107_v19, 7 }
  0x6e   :  { %561 = vmatpush3.bf16.msra.mxu0 %v122_v3  ;;  %567 = vmatpush3.bf16.msra.mxu1 %v637_v5  ;;  %v642_v10 = vld [vmem:[#allocation6 + $0x28] sm:$0xff]   ;;  %v643_v11 = vld [vmem:[#allocation6 + $0x30] sm:$0xff]   ;;  %v644_v12 = vld [vmem:[#allocation6 + $0x38] sm:$0xff]  }
  0x6f   :  { %586 = vmatprep.subr.bf16.mxu0 %v809_v0  ;;  %568 = vmatprep.subr.bf16.mxu1 %v809_v0  ;;  %v645_v13 = vld [vmem:[#allocation7] sm:$0xff]   ;;  %v646_v14 = vld [vmem:[#allocation7 + $0x8] sm:$0xff]   ;;  %v647_v15 = vld [vmem:[#allocation7 + $0x10] sm:$0xff]   ;;  %v109_v21 = vsub.s32 0, %v953_v20  ;;  %v184_v39 = vsub.s32 1, %v953_v20  ;;  %v294_v50 = vsub.s32 2, %v953_v20 }
  0x70   :  { %v648_v16 = vld [vmem:[#allocation7 + $0x18] sm:$0xff]   ;;  %v649_v17 = vld [vmem:[#allocation7 + $0x20] sm:$0xff]   ;;  %v650_v18 = vld [vmem:[#allocation7 + $0x28] sm:$0xff]   ;;  %v404_v59 = vsub.s32 3, %v953_v20 }
  0x71   :  { %563 = vmatmul.mubr.msk.bf16.vlgmr.msra.gmra.mrb[0].mxu0 %vm116_vm2, %v104_v4  ;;  %v102_v22 = vld [vmem:[#allocation10] sm:$0xf]  ;;  %v651_v31 = vld [vmem:[#allocation7 + $0x30] sm:$0xff]   ;;  %v652_v32 = vld [vmem:[#allocation7 + $0x38] sm:$0xff]  }
  0x72   :  { %602 = vmatprep.mubr.msk.bf16.mxu0 %vm810_vm0, %v809_v0  ;;  %569 = vmatpush3.bf16.msra.mxu1 %v638_v6  ;;  %v110_v23 = vrot.slane %v102_v22, %v109_v21  ;;  %v653_v33 = vld [vmem:[#allocation9] sm:$0xff]   ;;  %v654_v34 = vld [vmem:[#allocation9 + $0x8] sm:$0xff]   ;;  %v655_v35 = vld [vmem:[#allocation9 + $0x10] sm:$0xff]   ;;  %v185_v40 = vrot.slane %v102_v22, %v184_v39  ;;  %v295_v51 = vrot.slane %v102_v22, %v294_v50 }
  0x73   :  { %570 = vmatprep.subr.bf16.mxu1 %v809_v0  ;;  %587 = vmatpush3.bf16.msra.mxu0 %v645_v13  ;;  %v656_v36 = vld [vmem:[#allocation9 + $0x18] sm:$0xff]   ;;  %v657_v37 = vld [vmem:[#allocation9 + $0x20] sm:$0xff]   ;;  %v658_v38 = vld [vmem:[#allocation9 + $0x28] sm:$0xff]   ;;  %v405_v60 = vrot.slane %v102_v22, %v404_v59 }
  0x74   :  { %588 = vmatprep.subr.bf16.mxu0 %v809_v0  ;;  %v659_v48 = vld [vmem:[#allocation9 + $0x30] sm:$0xff]   ;;  %v660_v49 = vld [vmem:[#allocation9 + $0x38] sm:$0xff]  }
  0x76   :  { %571 = vmatpush3.bf16.msra.mxu1 %v639_v7 }
  0x77   :  { %572 = vmatprep.subr.bf16.mxu1 %v809_v0  ;;  %589 = vmatpush3.bf16.msra.mxu0 %v646_v14 }
  0x78   :  { %590 = vmatprep.subr.bf16.mxu0 %v809_v0 }
  0x7a   :  { %573 = vmatpush3.bf16.msra.mxu1 %v640_v8 }
  0x7b   :  { %574 = vmatprep.subr.bf16.mxu1 %v809_v0  ;;  %591 = vmatpush3.bf16.msra.mxu0 %v647_v15 }
  0x7c   :  { %592 = vmatprep.subr.bf16.mxu0 %v809_v0 }
  0x7e   :  { %575 = vmatpush3.bf16.msra.mxu1 %v641_v9 }
  0x7f   :  { %576 = vmatprep.subr.bf16.mxu1 %v809_v0  ;;  %593 = vmatpush3.bf16.msra.mxu0 %v648_v16 }
  0x80   :  { %594 = vmatprep.subr.bf16.mxu0 %v809_v0 }
  0x82   :  { %577 = vmatpush3.bf16.msra.mxu1 %v642_v10 }
  0x83   :  { %578 = vmatprep.subr.bf16.mxu1 %v809_v0  ;;  %595 = vmatpush3.bf16.msra.mxu0 %v649_v17 }
  0x84   :  { %596 = vmatprep.subr.bf16.mxu0 %v809_v0 }
  0x86   :  { %579 = vmatpush3.bf16.msra.mxu1 %v643_v11 }
  0x87   :  { %580 = vmatprep.subr.bf16.mxu1 %v809_v0  ;;  %597 = vmatpush3.bf16.msra.mxu0 %v650_v18 }
  0x88   :  { %598 = vmatprep.subr.bf16.mxu0 %v809_v0 }
  0x8a   :  { %581 = vmatpush3.bf16.msra.mxu1 %v644_v12 }
  0x8b   :  { %606 = vmatprep.subr.bf16.mxu1 %v809_v0  ;;  %599 = vmatpush3.bf16.msra.mxu0 %v651_v31 }
  0x8c   :  { %600 = vmatprep.subr.bf16.mxu0 %v809_v0 }
  0x8f   :  { %601 = vmatpush3.bf16.msra.mxu0 %v652_v32 }
 0x144   :  { %v158_v24 = vpop.f32.mrb[0].mxu0 }
 0x145   :  { %v159_v25 = vadd.f32 %v158_v24, %v110_v23  ;;  %v564_v26 = vpop.f32.mrb[1].mxu0 }
 0x146   :  { %v161_v27 = vpop.f32.mrb[2].mxu0 }
 0x147   :  { %v164_v28 = vmax.f32 %v159_v25, 0.0  ;;  %v565_v29 = vpop.f32.mrb[3].mxu0 }
 0x149   :  { %v165_v30 = vpack.c.bf16 %v164_v28, %v164_v28 }
 0x14b   :  { %583 = vmatmul.mubr.bf16.vlgmr.msra.gmra.mrb[0].mxu1 %v165_v30 }
 0x14c   :  { %622 = vmatprep.mubr.msk.bf16.mxu1 %vm810_vm0, %v809_v0  ;;  %607 = vmatpush3.bf16.msra.mxu1 %v653_v33 }
 0x14d   :  { %608 = vmatprep.subr.bf16.mxu1 %v809_v0 }
 0x150   :  { %609 = vmatpush3.bf16.msra.mxu1 %v654_v34 }
 0x151   :  { %610 = vmatprep.subr.bf16.mxu1 %v809_v0 }
 0x154   :  { %611 = vmatpush3.bf16.msra.mxu1 %v655_v35 }
 0x155   :  { %612 = vmatprep.subr.bf16.mxu1 %v809_v0 }
 0x158   :  { %613 = vmatpush3.bf16.msra.mxu1 %v656_v36 }
 0x159   :  { %614 = vmatprep.subr.bf16.mxu1 %v809_v0 }
 0x15c   :  { %615 = vmatpush3.bf16.msra.mxu1 %v657_v37 }
 0x15d   :  { %616 = vmatprep.subr.bf16.mxu1 %v809_v0 }
 0x160   :  { %617 = vmatpush3.bf16.msra.mxu1 %v658_v38 }
 0x161   :  { %618 = vmatprep.subr.bf16.mxu1 %v809_v0 }
 0x164   :  { %619 = vmatpush3.bf16.msra.mxu1 %v659_v48 }
 0x165   :  { %620 = vmatprep.subr.bf16.mxu1 %v809_v0 }
 0x168   :  { %621 = vmatpush3.bf16.msra.mxu1 %v660_v49 }
 0x21e   :  { %v268_v41 = vpop.f32.mrb[0].mxu1 }
 0x21f   :  { %v269_v42 = vadd.f32 %v268_v41, %v185_v40  ;;  %v584_v43 = vpop.f32.mrb[1].mxu1 }
 0x220   :  { %v271_v44 = vpop.f32.mrb[2].mxu1 }
 0x221   :  { %v274_v45 = vmax.f32 %v269_v42, 0.0  ;;  %v585_v46 = vpop.f32.mrb[3].mxu1 }
 0x223   :  { %v275_v47 = vpack.c.bf16 %v274_v45, %v274_v45 }
 0x225   :  { %603 = vmatmul.mubr.bf16.vlgmr.msra.gmra.mrb[4].mxu0 %v275_v47 }
 0x2f8   :  { %v378_v52 = vpop.f32.mrb[4].mxu0 }
 0x2f9   :  { %v379_v53 = vadd.f32 %v378_v52, %v295_v51  ;;  %v604_v54 = vpop.f32.mrb[5].mxu0 }
 0x2fa   :  { %v381_v55 = vpop.f32.mrb[6].mxu0 }
 0x2fb   :  { %v384_v56 = vmax.f32 %v379_v53, 0.0  ;;  %v605_v57 = vpop.f32.mrb[7].mxu0 }
 0x2fd   :  { %v385_v58 = vpack.c.bf16 %v384_v56, %v384_v56 }
 0x2ff   :  { %623 = vmatmul.mubr.bf16.vlgmr.msra.gmra.mrb[4].mxu1 %v385_v58 }
 0x3d2   :  { %v488_v61 = vpop.f32.mrb[4].mxu1 }
 0x3d3   :  { %v489_v62 = vadd.f32 %v488_v61, %v405_v60  ;;  %v624_v63 = vpop.f32.mrb[5].mxu1 }
 0x3d4   :  { %v491_v0 = vpop.f32.mrb[6].mxu1 }
 0x3d5   :  { %v494_v1 = vmax.f32 %v489_v62, 0.0  ;;  %v625_v2 = vpop.f32.mrb[7].mxu1 }
 0x3d7   :  { %v495_v3 = vpack.c.bf16 %v494_v1, %v494_v1 }
 0x3d9   :  { %496 = vst [vmem:[%s978_s6] sm:$0xf] %v495_v3 }
 0x3da   :  { %501 = vsyncpa [#allocation3], 1 }
 0x3db   :  { %502 = vsyncpa [#allocation5], 1 }
 0x3dc   :  { %503 = vsyncpa [#allocation8], 1 }
 0x3dd   :  { %504 = vsyncpa [#allocation11], 1 }

</bundles_post_ra>
